<compile_context>
chip_gen: v7x
topology: tpu7x:2x2x1
jax: 0.10.0
libtpu: 0.0.40
codegen_flags: <defaults>
</compile_context>

<pallas_src>
import functools
import math

import jax
import jax.numpy as jnp
from jax.experimental import pallas as pl
from jax.experimental.pallas import tpu as pltpu


def make_positional_encoding_table(d_model: int, max_len: int = 5000,
                                   dtype=jnp.float32):
    """Deterministic PE buffer, identical math to the PyTorch __init__.

    Returns (max_len, d_model); the PyTorch module stores (max_len, 1, d_model)
    — the broadcast over batch happens inside the kernel.
    """
    position = jnp.arange(max_len, dtype=jnp.float32)[:, None]          # (L, 1)
    div_term = jnp.exp(
        jnp.arange(0, d_model, 2, dtype=jnp.float32)
        * (-math.log(10000.0) / d_model))                               # (D/2,)
    pe = jnp.zeros((max_len, d_model), dtype=jnp.float32)
    pe = pe.at[:, 0::2].set(jnp.sin(position * div_term))
    pe = pe.at[:, 1::2].set(jnp.cos(position * div_term))
    return pe.astype(dtype)


# ----------------------------------------------------------------------------
# Kernels
# ----------------------------------------------------------------------------
def _pe_add_kernel(x_ref, pe_ref, o_ref):
    """Eval mode: y = x + pe (dropout is identity)."""
    # x_ref: (TS, TB, D), pe_ref: (TS, D) -> broadcast over batch.
    o_ref[...] = (x_ref[...] + pe_ref[...][:, None, :]).astype(o_ref.dtype)


def _pe_add_dropout_kernel(rnd_ref, x_ref, pe_ref, o_ref, *,
                           threshold: int, scale: float):
    """Training mode: inverted dropout with an integer-threshold keep mask."""
    y = x_ref[...] + pe_ref[...][:, None, :]
    # rnd_ref holds uniform int32 values in [0, 2^31); keep iff >= threshold,
    # i.e. P(keep) = 1 - p. Pure integer compare — no per-element int->float
    # convert or float multiply for the mask.
    keep = rnd_ref[...] >= threshold
    o_ref[...] = jnp.where(keep, y * scale, jnp.zeros_like(y)).astype(o_ref.dtype)


# ----------------------------------------------------------------------------
# Tiling heuristics
# ----------------------------------------------------------------------------
def _choose_tiles(S: int, B: int, D: int, itemsize: int, use_dropout: bool):
    """Largest (TS, TB) whose double-buffered footprint fits a conservative
    VMEM budget (safe on v5e 16 MiB scoped default and v7x 64 MiB physical)."""
    budget = 8 * 1024 * 1024
    per_elem = 2 * itemsize + (4 if use_dropout else 0)   # x-in + out (+ bits)

    def tile_bytes(ts, tb):
        # 2x for the automatic double buffering; pe tile is the small extra.
        return 2 * (ts * tb * D * per_elem + ts * D * itemsize)

    # Tile the batch axis only when it is huge and still (8,·)-tileable;
    # otherwise keep the full batch per block (second-to-last dim must be a
    # multiple of 8 or equal to the full extent).
    TB = B
    if B > 8 and B % 8 == 0 and tile_bytes(8, B) > budget:
        TB = 8

    max_ts = budget // max(1, tile_bytes(1, TB))
    if max_ts >= S:
        TS = S                                   # full extent: always legal
    else:
        TS = max(8, (max_ts // 8) * 8)           # multiple-of-8 block rows
    return TS, TB


# ----------------------------------------------------------------------------
# Forward wrapper
# ----------------------------------------------------------------------------
def positional_encoding_forward(x, pe_table, *, p: float = 0.1,
                                training: bool = False, rng_key=None,
                                max_rows_per_tile=None):
    """Forward pass of PositionalEncoding.

    x: (S, B, D); pe_table: (max_len, D). Returns (S, B, D).
    """
    S, B, D = x.shape
    pe_slice = pe_table[:S].astype(x.dtype)                # pe[:x.size(0)]
    itemsize = jnp.dtype(x.dtype).itemsize
    use_dropout = bool(training) and p > 0.0

    TS, TB = _choose_tiles(S, B, D, itemsize, use_dropout)
    if max_rows_per_tile is not None:                      # test hook
        TS = min(TS, max_rows_per_tile)
        if TS < S:
            TS = max(8, (TS // 8) * 8)

    # Grid: S-tiles outer, B-tiles inner -> pe block index only changes with
    # the S-tile, so its DMA is reused across all batch tiles.
    grid = (pl.cdiv(S, TS), pl.cdiv(B, TB))

    x_spec = pl.BlockSpec((TS, TB, D), lambda si, bi: (si, bi, 0))
    pe_spec = pl.BlockSpec((TS, D), lambda si, bi: (si, 0))
    out_spec = pl.BlockSpec((TS, TB, D), lambda si, bi: (si, bi, 0))

    compiler_params = pltpu.CompilerParams(
        dimension_semantics=("parallel", "parallel"))

    out_shape = jax.ShapeDtypeStruct((S, B, D), x.dtype)

    if use_dropout:
        if rng_key is None:
            rng_key = jax.random.PRNGKey(0)
        # Uniform 31-bit integers (top bit cleared -> valid signed int32).
        bits = jax.random.bits(rng_key, (S, B, D), dtype=jnp.uint32)
        rnd = jax.lax.shift_right_logical(bits, jnp.uint32(1)).astype(jnp.int32)
        threshold = int(round(p * float(1 << 31)))         # P(keep) = 1 - p
        scale = 1.0 / (1.0 - p)
        kernel = functools.partial(_pe_add_dropout_kernel,
                                   threshold=threshold, scale=scale)
        in_specs = [x_spec, x_spec, pe_spec]               # rnd tiles like x
        args = (rnd, x, pe_slice)
    else:
        kernel = _pe_add_kernel
        in_specs = [x_spec, pe_spec]
        args = (x, pe_slice)

    return pl.pallas_call(
        kernel,
        out_shape=out_shape,
        grid=grid,
        in_specs=in_specs,
        out_specs=out_spec,
        compiler_params=compiler_params,
    )(*args)


# ----------------------------------------------------------------------------
# Self-test
# ----------------------------------------------------------------------------
if __name__ == "__main__":
    # Small shapes consistent with the module: seq=16, batch=4, d_model=128
    # (d_model = 128 keeps the lane dimension dense).
    S, B, D = 16, 4, 128
    key = jax.random.PRNGKey(0)
    kx, kdrop = jax.random.split(key)
    x = jax.random.normal(kx, (S, B, D), dtype=jnp.float32)

    pe_table = make_positional_encoding_table(D, max_len=5000)
    ref = x + pe_table[:S][:, None, :]

    # Eval-mode forward (dropout = identity) — deterministic, checkable.
    # max_rows_per_tile=8 forces a 2x1 grid so the pipelined path is exercised.
    out_eval = positional_encoding_forward(x, pe_table, p=0.1, training=False,
                                           max_rows_per_tile=8)
    out_eval = jax.block_until_ready(out_eval)
    assert out_eval.shape == (S, B, D)
    assert jnp.allclose(out_eval, ref, atol=1e-6, rtol=1e-6), "mismatch vs reference"

    # Training-mode forward (exercises the dropout-masking path).
    out_train = positional_encoding_forward(x, pe_table, p=0.1, training=True,
                                            rng_key=kdrop, max_rows_per_tile=8)
    out_train = jax.block_until_ready(out_train)
    scaled_ref = ref / (1.0 - 0.1)
    ok = jnp.logical_or(jnp.isclose(out_train, scaled_ref, atol=1e-5, rtol=1e-5),
                        out_train == 0.0)
    assert bool(jnp.all(ok)), "dropout output not consistent with inverted-dropout"
    drop_frac = float(jnp.mean((out_train == 0.0).astype(jnp.float32)))
    assert 0.02 <= drop_frac <= 0.25, f"drop fraction {drop_frac} far from p=0.1"

    print("KERNEL_OK")
</pallas_src>

<mosaic_0001>
module attributes {stable_mosaic.version = 11 : i64} {
  func.func @_pe_add_kernel(%arg0: i32, %arg1: i32, %arg2: memref<8x4x128xf32, #tpu.memory_space<vmem>>, %arg3: memref<8x128xf32, #tpu.memory_space<vmem>>, %arg4: memref<8x4x128xf32, #tpu.memory_space<vmem>>) attributes {dimension_semantics = [#tpu.dimension_semantics<parallel>, #tpu.dimension_semantics<parallel>], iteration_bounds = array<i64: 2, 1>, scalar_prefetch = 0 : i64, scratch_operands = 0 : i64, tpu.core_type = #tpu.core_type<tc>, window_params = [{transform_indices = @transform_0, window_bounds = array<i64: 8, 4, 128>}, {transform_indices = @transform_1, window_bounds = array<i64: 8, 128>}, {transform_indices = @transform_2, window_bounds = array<i64: 8, 4, 128>}]} {
    %c0 = arith.constant 0 : index
    %c0_0 = arith.constant 0 : index
    %c0_1 = arith.constant 0 : index
    %0 = vector.load %arg2[%c0, %c0_0, %c0_1] : memref<8x4x128xf32, #tpu.memory_space<vmem>>, vector<8x4x128xf32>
    %c0_2 = arith.constant 0 : index
    %c0_3 = arith.constant 0 : index
    %1 = vector.load %arg3[%c0_2, %c0_3] : memref<8x128xf32, #tpu.memory_space<vmem>>, vector<8x128xf32>
    %2 = vector.shape_cast %1 : vector<8x128xf32> to vector<8x1x128xf32>
    %3 = vector.broadcast %2 : vector<8x1x128xf32> to vector<8x4x128xf32>
    %4 = arith.addf %0, %3 : vector<8x4x128xf32>
    %c0_4 = arith.constant 0 : index
    %c0_5 = arith.constant 0 : index
    %c0_6 = arith.constant 0 : index
    %5 = vector.load %arg4[%c0_4, %c0_5, %c0_6] : memref<8x4x128xf32, #tpu.memory_space<vmem>>, vector<8x4x128xf32>
    tpu.vector_store %arg4[%c0_4, %c0_5, %c0_6], %4 {strides = array<i32>} : memref<8x4x128xf32, #tpu.memory_space<vmem>>, vector<8x4x128xf32>,
    return
  }
  func.func @transform_0(%arg0: i32, %arg1: i32) -> (i32, i32, i32) {
    %c0_i32 = arith.constant 0 : i32
    %c0_i32_0 = arith.constant 0 : i32
    return %arg0, %arg1, %c0_i32 : i32, i32, i32
  }
  func.func @transform_1(%arg0: i32, %arg1: i32) -> (i32, i32) {
    %c0_i32 = arith.constant 0 : i32
    %c0_i32_0 = arith.constant 0 : i32
    return %arg0, %c0_i32 : i32, i32
  }
  func.func @transform_2(%arg0: i32, %arg1: i32) -> (i32, i32, i32) {
    %c0_i32 = arith.constant 0 : i32
    %c0_i32_0 = arith.constant 0 : i32
    return %arg0, %arg1, %c0_i32 : i32, i32, i32
  }
}

</mosaic_0001>

<bundles_post_ra>
// kernel: tpu_custom_call.1
= control target key start
LH: loop header
LB: loop body
LE: loop exit
PB: predicated region body
PF: predicated region fallthrough
CT: control target
= control target key end

     0   :  { %7 = vsyncpa [#allocation3], 0  ;;  %s951_s0 = inlined_call_operand.hbm [shape: f32[16,4,128], index: 0, kind: input, shape index: {}]   ;;  %s952_s1 = inlined_call_operand.hbm [shape: f32[16,128], index: 1, kind: input, shape index: {}]   ;;  %s953_s2 = inlined_call_operand.hbm [shape: f32[16,4,128], index: 2, kind: output, shape index: {}]  }
   0x1   :  { %9 = vsyncpa [#allocation3 + $0x1], 0 }
   0x2   :  { %10 = vsyncpa [#allocation6], 0 }
   0x3   :  { %12 = vsyncpa [#allocation6 + $0x1], 0 }
   0x4   :  { %13 = vsyncpa [#allocation4], 0 }
   0x5   :  { %15 = vsyncpa [#allocation4 + $0x1], 0  ;;  %s720_s9 = smov 0   ;;  %s722_s10 = smov 0  }
   0x6   :  { %s724_s11 = smov 0   ;;  %s726_s12 = smov 0  }
   0x7   :  { %s728_s13 = smov 0   ;;  %s730_s14 = smov 0  }
   0x8 LB: > { %s456_s15 = sadd.s32 4294967295, %s695_s14   ;;  %s457_s16 = sadd.s32 4294967294, %s695_s14   ;;  %s695_s14 = sphi %s730_s14, %s21_s14   ;;  %s691_s13 = sphi %s728_s13, %s972_s13   ;;  %s687_s12 = sphi %s726_s12, %s971_s12   ;;  %s683_s11 = sphi %s724_s11, %s970_s11   ;;  %s679_s10 = sphi %s722_s10, %s969_s10   ;;  %s675_s9 = sphi %s720_s9, %s968_s9  }
   0x9   : > { %s33_s17 = sadd.s32 1, %s691_s13  ;;  %s42_s18 = sadd.s32 1, %s683_s11 }
   0xa   : > { %p35_p0 = scmp.ge.s32.totalorder %s33_s17, 2  ;;  %p49_p1 = scmp.ne.s32.totalorder %s683_s11, %s679_s10 }
   0xb   : > { %p50_p2 = scmp.eq.s32.totalorder %s695_s14, 0  ;;  %p55_p3 = scmp.ne.s32.totalorder %s679_s10, %s675_s9 }
   0xc   : > { %s974_s17 = smov (%p35_p0, %s33_s17), 0  ;;  %p56_p5 = scmp.eq.s32.totalorder %s456_s15, 0 }
   0xd   : > { %p761_p4 = por %p50_p2, %p49_p1  ;;  %s37_s20 = ssub.s32 %s691_s13, %s974_s17 }
   0xe   : > { %p107_p6 = scmp.eq.s32.totalorder %s456_s15, 1  ;;  %p40_p7 = scmp.eq.s32.totalorder %s37_s20, 0 }
   0xf   : > { %p767_p8 = por %p56_p5, %p55_p3  ;;  %p113_p10 = scmp.eq.s32.totalorder %s457_s16, 1 }
  0x10   : > { %p771_p9 = por %p107_p6, %p49_p1  ;;  %p493_p13 = scmp.lt.s32.totalorder %s695_s14, 2 }
  0x11   : > { %s957_s21 = scalar_select %p767_p8, 1, 0 }
  0x12   : > { %s958_s22 = scalar_select %p771_p9, 1, 0 }
  0x13   : > { %s776_s23 = scalar_select %p40_p7, %s683_s11, %s42_s18  }
  0x14   : > { %p778_p11 = por %p113_p10, %p55_p3  ;;  %s785_s25 = sand.u32 1, %s683_s11  }
  0x15   : > { %s460_s26 = sshll.u32 %s785_s25, 5  ;;  %s474_s27 = sshll.u32 %s691_s13, 9 }
  0x16   : > { %s959_s24 = scalar_select %p778_p11, 1, 0 }
  0x17   : > { %s792_s30 = scalar_lea.hbm %s951_s0, %s474_s27  ;;  %s137_s3 = scalar_lea.vmem [#allocation2], %s460_s26 }
  0x18   : > { %s145_s4 = sshll.u32 %s137_s3, 4  ;;  %p798_p0 = pnand %p493_p13, %p761_p4  ;;  %s794_s4 = int_to_ptr.vmem [resolvable:$true] %s145_s4 }
  0x19   : > { %s134_s6 = scalar_lea.sflag [#allocation3], %s785_s25  ;;  %s549_s7 = scalar_lea.hbm %s792_s30, 512 }
  0x1a   : > { %p550_p2 = scmp.ne.s32.totalorder %s792_s30, %s549_s7  ;;  %p551_p3 = pneg %p798_p0 }
  0x1b   : > { %s554_s16 = scalar_lea.hbm %s951_s0, 1024  ;;  %p555_p4 = scmp.lt.u32.totalorder %s792_s30, %s951_s0 }
  0x1c   : > { %p552_p5 = pnand %p551_p3, %p550_p2  ;;  %p556_p7 = scmp.lt.u32.totalorder %s554_s16, %s549_s7 }
  0x1d   : > { %p558_p13 = scmp.lt.u32.totalorder %s549_s7, %s792_s30 }
  0x1e   : > { %p553_p6 = pneg %p552_p5  ;;  %p557_p10 = por %p556_p7, %p555_p4 }
  0x20   : > { %p559_p12 = por %p558_p13, %p557_p10 }
  0x22   : > { %p560_p1 = pnand %p559_p12, %p553_p6 }
  0x24   : > { %563 = shalt.err (!%p560_p1)
}
  0x25   : > { %s564_s20 = scalar_lea.vmem %s794_s4, 512  ;;  %s697_s26 = smov [#allocation2]  }
  0x26   : > { %p565_p2 = scmp.ne.s32.totalorder %s794_s4, %s564_s20  ;;  %s569_s27 = sshll.u32 %s697_s26, 4  ;;  %s570_s27 = int_to_ptr.vmem [resolvable:$false] %s569_s27 }
  0x27   : > { %s571_s28 = scalar_lea.vmem %s570_s27, 1024  ;;  %p572_p9 = scmp.lt.s32.totalorder %s794_s4, %s570_s27 }
  0x28   : > { %p567_p5 = pnand %p565_p2, %p551_p3  ;;  %p573_p4 = scmp.lt.s32.totalorder %s571_s28, %s564_s20 }
  0x2a   : > { %p568_p11 = pneg %p567_p5  ;;  %p574_p7 = por %p573_p4, %p572_p9 }
  0x2c   : > { %p575_p10 = pnand %p574_p7, %p568_p11 }
  0x2e   : > { %578 = shalt.err (!%p575_p10)
}
  0x2f   : > { %s698_s29 = smov 64   ;;  %s699_s3 = smov 4  }
  0x30   : > { %485 = dma.hbm_to_vmem [thread:$0]  (!%p798_p0), %s792_s30, 512, %s794_s4, %s134_s6, %s698_s29, %s698_s29, %s699_s3  }
  0x31   : > { %p171_p12 = scmp.lt.s32.totalorder %s695_s14, 3  ;;  %s463_s7 = sshll.u32 %s785_s25, 3 }
  0x32   : > { %s464_s8 = sshll.u32 %s691_s13, 7  ;;  %p961_p9 = scmp.ge.s32.totalorder %s695_s14, 1 }
  0x33   : > { %s843_s19 = scalar_lea.hbm %s952_s1, %s464_s8  ;;  %s159_s20 = scalar_lea.vmem [#allocation5], %s463_s7 }
  0x34   : > { %p836_p11 = pnand %p961_p9, %p171_p12  ;;  %s166_s26 = sshll.u32 %s159_s20, 4  ;;  %s167_s26 = int_to_ptr.vmem [resolvable:$true] %s166_s26 }
  0x35   : > { %s156_s30 = scalar_lea.sflag [#allocation6], %s785_s25  ;;  %s579_s4 = scalar_lea.hbm %s843_s19, 128 }
  0x36   : > { %s962_s15 = scalar_select %p836_p11, 1, 0 }
  0x37   : > { %p580_p1 = scmp.ne.s32.totalorder %s843_s19, %s579_s4  ;;  %s584_s28 = scalar_lea.hbm %s952_s1, 256 }
  0x38   : > { %p585_p2 = scmp.lt.u32.totalorder %s843_s19, %s952_s1  ;;  %p586_p5 = scmp.lt.u32.totalorder %s584_s28, %s579_s4 }
  0x39   : > { %p582_p6 = pnand %p580_p1, %p551_p3  ;;  %p588_p7 = scmp.lt.u32.totalorder %s579_s4, %s843_s19 }
  0x3a   : > { %p587_p4 = por %p586_p5, %p585_p2 }
  0x3b   : > { %p583_p13 = pneg %p582_p6 }
  0x3c   : > { %p589_p10 = por %p588_p7, %p587_p4 }
  0x3e   : > { %p590_p12 = pnand %p589_p10, %p583_p13 }
  0x40   : > { %593 = shalt.err (!%p590_p12)
}
  0x41   : > { %s594_s25 = scalar_lea.vmem %s167_s26, 128  ;;  %s700_s7 = smov [#allocation5]  }
  0x42   : > { %p595_p9 = scmp.ne.s32.totalorder %s167_s26, %s594_s25  ;;  %s599_s8 = sshll.u32 %s700_s7, 4  ;;  %s600_s8 = int_to_ptr.vmem [resolvable:$false] %s599_s8 }
  0x43   : > { %s601_s16 = scalar_lea.vmem %s600_s8, 256  ;;  %p602_p8 = scmp.lt.s32.totalorder %s167_s26, %s600_s8 }
  0x44   : > { %p597_p1 = pnand %p595_p9, %p551_p3  ;;  %p603_p11 = scmp.lt.s32.totalorder %s601_s16, %s594_s25 }
  0x46   : > { %p598_p6 = pneg %p597_p1  ;;  %p604_p2 = por %p603_p11, %p602_p8 }
  0x48   : > { %p605_p5 = pnand %p604_p2, %p598_p6 }
  0x4a   : > { %608 = shalt.err (!%p605_p5)
}
  0x4b   : > { %488 = dma.hbm_to_vmem [thread:$0]  (!%p798_p0), %s843_s19, 128, %s167_s26, %s156_s30  }
  0x4c   : > { %p963_p13 = scmp.ne.s32.totalorder %s962_s15, 0 }
  0x4d   : > { %s868_s18 = sand.u32 (!%p963_p13), 1, %s679_s10   ;;  %p964_p8 = scmp.ne.s32.totalorder (!%p963_p13), %s957_s21, 0 }
  0x4e   : > { %175 = sbr.rel (%p963_p13) target bundleno = 124 (0x7c), region = 28  ;;  %s466_s20 = sshll.u32 (!%p963_p13), %s868_s18, 5 }
  0x4f   : > { %s178_s4 = scalar_lea.sflag (!%p963_p13), [#allocation3], %s868_s18  ;;  %s874_s6 = scalar_lea.vmem (!%p963_p13), [#allocation2], %s466_s20 }
  0x55   : > { %662 = dma.done.wait (%p964_p8), %s178_s4, 512  }
  0x56   : > { %664 = vsyncadd (%p964_p8), %s178_s4, 4294966784  ;;  %s467_s5 = sshll.u32 %s868_s18, 3  ;;  %s187_s15 = scalar_lea.sflag [#allocation6], %s868_s18 }
  0x57   : > { %s190_s19 = scalar_lea.vmem [#allocation5], %s467_s5 }
  0x58   : > { %666 = dma.done.wait (%p964_p8), %s187_s15, 128  }
  0x59   : > { %668 = vsyncadd (%p964_p8), %s187_s15, 4294967168  ;;  %v232_v0 = vlaneseq  ;;  %v701_v1 = vmov 1966171168   ;;  %v226_v6 = vld [vmem:[%s190_s19] sm:$0xff]  ;;  %v222_v25 = vld [vmem:[%s874_s6 + $0x10] sm:$0xf] }
  0x5a   : > { %v230_v2 = vunpack.c.l.s4 %v701_v1  ;;  %v228_v9 = vcombine.high %v226_v6, %v226_v6  ;;  %v218_v13 = vld [vmem:[%s874_s6] sm:$0xf]  ;;  %v219_v18 = vld [vmem:[%s874_s6 + $0x4] sm:$0xf]  ;;  %v220_v19 = vld [vmem:[%s874_s6 + $0x8] sm:$0xf] }
  0x5b   : > { %v233_v3 = vshrl.u32 %v232_v0, 7  ;;  %v221_v26 = vld [vmem:[%s874_s6 + $0xc] sm:$0xf]  ;;  %s215_s21 = scalar_lea.vmem [#allocation7], %s466_s20  ;;  %v223_v33 = vld [vmem:[%s874_s6 + $0x14] sm:$0xf] }
  0x5c   : > { %v231_v4 = vunpack.c.0.s8 %v230_v2  ;;  %v224_v34 = vld [vmem:[%s874_s6 + $0x18] sm:$0xf]  ;;  %s348_s26 = sshll.u32 %s215_s21, 4  ;;  %s475_s30 = sshll.u32 %s687_s12, 9  ;;  %v225_v40 = vld [vmem:[%s874_s6 + $0x1c] sm:$0xf]  ;;  %s897_s26 = int_to_ptr.vmem [resolvable:$true] %s348_s26 }
  0x5d   : > { %v279_v8 = vsub.s32 0, %v233_v3  ;;  %s902_s12 = scalar_lea.hbm %s953_s2, %s475_s30  ;;  %s334_s29 = scalar_lea.sflag [#allocation4], %s868_s18 }
  0x5e   : > { %v234_v5 = vsub.s32 %v231_v4, %v233_v3  ;;  %s609_s3 = scalar_lea.vmem %s897_s26, 512  ;;  %p965_p3 = scmp.ne.s32.totalorder %s958_s22, 0 }
  0x5f   : > { %p610_p0 = scmp.ne.s32.totalorder %s897_s26, %s609_s3  ;;  %s702_s25 = smov [#allocation7]  }
  0x60   : > { %v235_v7 = vrot.slane %v226_v6, %v234_v5  ;;  %v242_v12 = vrot.slane %v228_v9, %v234_v5  ;;  %s613_s7 = sshll.u32 %s702_s25, 4  ;;  %s614_s7 = int_to_ptr.vmem [resolvable:$false] %s613_s7 }
  0x61   : > { %p611_p11 = pnand %p610_p0, %p965_p3  ;;  %s615_s8 = scalar_lea.vmem %s614_s7, 1024 }
  0x62   : > { %v251_v10 = vrot.slane %v235_v7, %v234_v5  ;;  %v243_v11 = vcombine.high %v235_v7, %v235_v7  ;;  %v258_v17 = vrot.slane %v242_v12, %v234_v5  ;;  %v244_v20 = vcombine.high %v242_v12, %v242_v12  ;;  %p616_p7 = scmp.lt.s32.totalorder %s897_s26, %s614_s7  ;;  %p617_p10 = scmp.lt.s32.totalorder %s615_s8, %s609_s3 }
  0x63   : > { %p612_p4 = pneg %p611_p11 }
  0x64   : > { %v280_v14 = vrot.slane %v251_v10, %v279_v8  ;;  %v265_v15 = vrot.slane %v243_v11, %v234_v5  ;;  %v273_v16 = vcombine.high %v251_v10, %v251_v10  ;;  %v296_v27 = vrot.slane %v258_v17, %v279_v8  ;;  %p618_p12 = por %p617_p10, %p616_p7 }
  0x65   : > { %v272_v28 = vrot.slane %v244_v20, %v234_v5  ;;  %v274_v29 = vcombine.high %v258_v17, %v258_v17 }
  0x66   : > { %v317_v21 = vadd.f32 %v280_v14, %v218_v13  ;;  %v284_v22 = vrot.slane %v265_v15, %v279_v8  ;;  %v288_v23 = vrot.slane %v273_v16, %v279_v8  ;;  %v275_v24 = vcombine.high %v265_v15, %v265_v15  ;;  %p619_p9 = pnand %p618_p12, %p612_p4 }
  0x67   : > { %v321_v35 = vadd.f32 %v296_v27, %v222_v25  ;;  %v300_v36 = vrot.slane %v272_v28, %v279_v8  ;;  %v304_v37 = vrot.slane %v274_v29, %v279_v8  ;;  %v276_v38 = vcombine.high %v272_v28, %v272_v28 }
  0x68   : > { %325 = vst [vmem:[%s215_s21] sm:$0xf] %v317_v21  ;;  %v318_v30 = vadd.f32 %v284_v22, %v219_v18  ;;  %v319_v31 = vadd.f32 %v288_v23, %v220_v19  ;;  %v292_v32 = vrot.slane %v275_v24, %v279_v8 }
  0x69   : > { %329 = vst [vmem:[%s215_s21 + $0x10] sm:$0xf] %v321_v35  ;;  %v322_v41 = vadd.f32 %v300_v36, %v223_v33  ;;  %v323_v42 = vadd.f32 %v304_v37, %v224_v34  ;;  %v308_v43 = vrot.slane %v276_v38, %v279_v8 }
  0x6a   : > { %326 = vst [vmem:[%s215_s21 + $0x4] sm:$0xf] %v318_v30  ;;  %327 = vst [vmem:[%s215_s21 + $0x8] sm:$0xf] %v319_v31  ;;  %v320_v39 = vadd.f32 %v292_v32, %v221_v26 }
  0x6b   : > { %330 = vst [vmem:[%s215_s21 + $0x14] sm:$0xf] %v322_v41  ;;  %331 = vst [vmem:[%s215_s21 + $0x18] sm:$0xf] %v323_v42  ;;  %v324_v44 = vadd.f32 %v308_v43, %v225_v40 }
  0x6c   : > { %328 = vst [vmem:[%s215_s21 + $0xc] sm:$0xf] %v320_v39 }
  0x6d   : > { %332 = vst [vmem:[%s215_s21 + $0x1c] sm:$0xf] %v324_v44 }
  0x6e   : > { %622 = shalt.err (!%p619_p9)
}
  0x6f   : > { %s623_s16 = scalar_lea.hbm %s902_s12, 512  ;;  %s627_s6 = scalar_lea.hbm %s953_s2, 1024 }
  0x70   : > { %p624_p1 = scmp.ne.s32.totalorder %s902_s12, %s623_s16  ;;  %p628_p5 = scmp.lt.u32.totalorder %s902_s12, %s953_s2 }
  0x71   : > { %p629_p13 = scmp.lt.u32.totalorder %s627_s6, %s623_s16  ;;  %p631_p0 = scmp.lt.u32.totalorder %s623_s16, %s902_s12 }
  0x72   : > { %p625_p6 = pnand %p624_p1, %p965_p3 }
  0x73   : > { %p630_p8 = por %p629_p13, %p628_p5 }
  0x74   : > { %p626_p2 = pneg %p625_p6 }
  0x75   : > { %p632_p11 = por %p631_p0, %p630_p8 }
  0x77   : > { %p633_p4 = pnand %p632_p11, %p626_p2 }
  0x79   : > { %636 = shalt.err (!%p633_p4)
}
  0x7a   : > { %s703_s19 = smov 64   ;;  %s704_s21 = smov 4  }
  0x7b   : > { %480 = dma.vmem_to_hbm [thread:$0]  (%p965_p3), %s897_s26, 512, %s902_s12, %s334_s29, %s703_s19, %s703_s19, %s704_s21  }
  0x7c PF: > { %s363_s30 = sand.u32 1, %s675_s9   ;;  %p966_p7 = scmp.ne.s32.totalorder %s959_s24, 0 }
  0x7d   : > { %p967_p10 = scmp.ge.s32.totalorder %s695_s14, 2  ;;  %s364_s27 = scalar_lea.sflag [#allocation4], %s363_s30 }
  0x7f   : > { %p490_p12 = pnand %p967_p10, %p966_p7 }
  0x81   : > { %670 = dma.done.wait (!%p490_p12), %s364_s27, 512  }
  0x82   : > { %672 = vsyncadd (!%p490_p12), %s364_s27, 4294966784  ;;  %s21_s14 = sadd.s32 1, %s695_s14   ;;  %s968_s9 = smov %s679_s10 }
  0x83   : > { %p18_p9 = scmp.ge.s32.totalorder %s21_s14, 4   ;;  %s969_s10 = smov %s683_s11 }
  0x84   : > { %s970_s11 = smov %s776_s23  ;;  %s971_s12 = smov %s691_s13 }
  0x85   : > { %s972_s13 = smov %s974_s17  ;;  %20 = sbr.rel (!%p18_p9) target bundleno = 8 (0x8), region = 86 }
  0x8c   :  { %369 = vsyncpa [#allocation3], 1 }
  0x8d   :  { %371 = vsyncpa [#allocation3 + $0x1], 1 }
  0x8e   :  { %372 = vsyncpa [#allocation6], 1 }
  0x8f   :  { %374 = vsyncpa [#allocation6 + $0x1], 1 }
  0x90   :  { %375 = vsyncpa [#allocation4], 1 }
  0x91   :  { %377 = vsyncpa [#allocation4 + $0x1], 1 }

</bundles_post_ra>
